<compile_context>
chip_gen: v7x
topology: tpu7x:2x2x1
jax: 0.10.0
libtpu: 0.0.40
codegen_flags: <defaults>
</compile_context>

<pallas_src>
import functools
import math

import jax
import jax.numpy as jnp
from jax.experimental import pallas as pl
from jax.experimental.pallas import tpu as pltpu

EPS = 1e-12
_TEN_OVER_LN10 = 10.0 / math.log(10.0)
_MIN_SPLIT_BLOCK_BYTES = 1 * 1024 * 1024  # never 2-way split below ~1 MiB/input


def _cdiv(a, b):
    return -(-a // b)


def _round_up(n, m):
    return ((n + m - 1) // m) * m


def _chip_budget():
    """Return (per-input block budget bytes, vmem_limit_bytes), generation-aware.

    v5e/v6e (128 MiB physical VMEM): big blocks are free -> 8 MiB per input.
    v7x (64 MiB physical VMEM) or unknown: ~6 MiB blocks amortize the ~0.35 us
    per-step cost against ~3.2 TB/s HBM; 2 inputs x 2 pipeline buffers x 6 MiB
    = 24 MiB stays well under the 48 MiB scoped limit.
    """
    try:
        vmem_cap = getattr(pltpu.get_tpu_info(), "vmem_capacity_bytes", None)
    except Exception:  # e.g. interpret mode / exotic backends
        vmem_cap = None
    if vmem_cap is not None and vmem_cap >= 96 * 1024 * 1024:
        return 8 * 1024 * 1024, 64 * 1024 * 1024
    return 6 * 1024 * 1024, 48 * 1024 * 1024


def _plan_tiles(R, T, itemsize, sublane, budget):
    """Pick (row_tile, t_tile) under a per-input-block byte budget."""
    if T * itemsize * sublane <= budget:
        # Whole T fits even at minimal rows: grid_k == 1 -> single-pass kernel,
        # fully contiguous per-row DMA, no mask, no accumulators.
        t_tile = T
        rows = budget // max(1, T * itemsize)
        rows = max(sublane, (rows // sublane) * sublane)
        row_cap = _round_up(R, sublane)
        row_tile = min(rows, row_cap)
        if row_tile >= row_cap:
            # Everything fits in one row block.  Split 2-way only if each half
            # still moves a large block (feeds both v7x TensorCores); otherwise
            # use exactly R rows (full-dim block, no padded garbage rows).
            half = _round_up(_cdiv(R, 2), sublane)
            if R > sublane and half * t_tile * itemsize >= _MIN_SPLIT_BLOCK_BYTES:
                row_tile = half
            else:
                row_tile = R
    else:
        # Very long T: stream T in budget-sized lane chunks at minimal rows so
        # each row's DMA run stays long and contiguous.
        t_tile = max(2048, (budget // (itemsize * sublane) // 128) * 128)
        row_tile = sublane if R >= sublane else R
    return row_tile, t_tile


def _sdr_kernel_single(x_ref, t_ref, loss_ref, *, eps):
    """Single T step per row block: compute SDR directly, no scratch."""
    x = x_ref[...].astype(jnp.float32)
    t = t_ref[...].astype(jnp.float32)
    d = t - x
    tt = jnp.sum(t * t, axis=-1, keepdims=True) + eps
    dd = jnp.sum(d * d, axis=-1, keepdims=True) + eps
    # 10*log10(tt/dd) = (10/ln10)*(ln tt - ln dd): EUP only, no per-row divide.
    loss_ref[...] = (_TEN_OVER_LN10 * (jnp.log(tt) - jnp.log(dd))).astype(loss_ref.dtype)


def _sdr_kernel_multi(x_ref, t_ref, loss_ref, tt_ref, dd_ref, *,
                      eps, t_total, t_tile, needs_mask):
    """Streaming accumulation of tt = sum(t^2), dd = sum((t-x)^2) over T tiles."""
    k = pl.program_id(1)
    nk = pl.num_programs(1)

    @pl.when(k == 0)
    def _init():
        tt_ref[...] = jnp.zeros_like(tt_ref)
        dd_ref[...] = jnp.zeros_like(dd_ref)

    def _accumulate(mask_tail):
        x = x_ref[...].astype(jnp.float32)
        t = t_ref[...].astype(jnp.float32)
        if mask_tail:
            # Ragged last T block: zero lanes past the true signal length.
            col = jax.lax.broadcasted_iota(jnp.int32, x.shape, 1)
            valid = (k * t_tile + col) < t_total
            x = jnp.where(valid, x, 0.0)
            t = jnp.where(valid, t, 0.0)
        d = t - x
        tt_ref[...] += jnp.sum(t * t, axis=-1, keepdims=True)
        dd_ref[...] += jnp.sum(d * d, axis=-1, keepdims=True)

    if needs_mask:
        # Mask only on the final T step; all other steps take the cheap
        # unmasked path (keeps the VPU at the HBM roofline on v7x).
        @pl.when(k < nk - 1)
        def _body():
            _accumulate(False)

        @pl.when(k == nk - 1)
        def _tail():
            _accumulate(True)
    else:
        _accumulate(False)

    @pl.when(k == nk - 1)
    def _finalize():
        tt = tt_ref[...] + eps
        dd = dd_ref[...] + eps
        loss_ref[...] = (_TEN_OVER_LN10 * (jnp.log(tt) - jnp.log(dd))).astype(loss_ref.dtype)


def _sdr_rows(x2d, t2d, eps=EPS, *, block_budget_bytes=None):
    """Per-row SDR for (R, T) inputs via Pallas. Returns (R,) float32."""
    R, T = x2d.shape
    itemsize = jnp.dtype(x2d.dtype).itemsize
    # Sublane alignment: 8 for 4-byte dtypes, 16 for bf16/fp16, 32 for 1-byte.
    sublane = 8 if itemsize >= 4 else max(8, 32 // itemsize)

    budget, vmem_limit = _chip_budget()
    if block_budget_bytes is not None:
        budget = int(block_budget_bytes)

    row_tile, t_tile = _plan_tiles(R, T, itemsize, sublane, budget)
    grid_r = _cdiv(R, row_tile)
    grid_k = _cdiv(T, t_tile)
    r_out = grid_r * row_tile  # output-only alignment padding; inputs untouched

    cost = pl.CostEstimate(
        flops=5 * R * T,
        transcendentals=2 * R,
        bytes_accessed=2 * R * T * itemsize + 4 * r_out,
    )

    if grid_k == 1:
        kernel = functools.partial(_sdr_kernel_single, eps=float(eps))
        grid_spec = pltpu.PrefetchScalarGridSpec(
            num_scalar_prefetch=0,
            grid=(grid_r,),
            in_specs=[
                pl.BlockSpec((row_tile, T), lambda i: (i, 0)),
                pl.BlockSpec((row_tile, T), lambda i: (i, 0)),
            ],
            out_specs=pl.BlockSpec((row_tile, 1), lambda i: (i, 0)),
        )
        dims = ("parallel",)
    else:
        needs_mask = (T % t_tile) != 0
        kernel = functools.partial(
            _sdr_kernel_multi, eps=float(eps), t_total=T, t_tile=t_tile,
            needs_mask=needs_mask)
        grid_spec = pltpu.PrefetchScalarGridSpec(
            num_scalar_prefetch=0,
            grid=(grid_r, grid_k),
            in_specs=[
                pl.BlockSpec((row_tile, t_tile), lambda i, k: (i, k)),
                pl.BlockSpec((row_tile, t_tile), lambda i, k: (i, k)),
            ],
            out_specs=pl.BlockSpec((row_tile, 1), lambda i, k: (i, 0)),
            scratch_shapes=[
                pltpu.VMEM((row_tile, 1), jnp.float32),  # tt accumulator
                pltpu.VMEM((row_tile, 1), jnp.float32),  # dd accumulator
            ],
        )
        dims = ("parallel", "arbitrary")

    out = pl.pallas_call(
        kernel,
        out_shape=jax.ShapeDtypeStruct((r_out, 1), jnp.float32),
        grid_spec=grid_spec,
        compiler_params=pltpu.CompilerParams(
            dimension_semantics=dims,
            vmem_limit_bytes=vmem_limit,
        ),
        cost_estimate=cost,
    )(x2d, t2d)
    return out[:R, 0]


def sdr(input, target, eps=EPS, *, block_budget_bytes=None):
    """Matches the PyTorch `sdr`: returns loss with shape input.shape[:-1]."""
    n_dims = input.ndim
    assert n_dims in (2, 3, 4), (
        'Only 2D or 3D or 4D tensor is acceptable, but given {}D tensor.'.format(n_dims))
    lead = input.shape[:-1]
    T = input.shape[-1]
    x2d = input.reshape(-1, T)
    t2d = target.reshape(-1, T)
    loss = _sdr_rows(x2d, t2d, eps=eps, block_budget_bytes=block_budget_bytes)
    return loss.reshape(lead)


class NegSDR:
    """JAX/Pallas port of the PyTorch NegSDR module forward pass."""

    def __init__(self, reduction='mean', eps=EPS):
        if reduction not in ['mean', 'sum', None]:
            raise ValueError('Invalid reduction type')
        self.reduction = reduction
        self.eps = eps

    def __call__(self, input, target, batch_mean=True):
        n_dims = input.ndim
        assert n_dims in (2, 3, 4), (
            'Only 2D or 3D or 4D tensor is acceptable, but given {}D tensor.'.format(n_dims))
        loss = -sdr(input, target, eps=self.eps)
        if self.reduction:
            if n_dims == 3:
                if self.reduction == 'mean':
                    loss = loss.mean(axis=1)
                elif self.reduction == 'sum':
                    loss = loss.sum(axis=1)
            elif n_dims == 4:
                if self.reduction == 'mean':
                    loss = loss.mean(axis=(1, 2))
                elif self.reduction == 'sum':
                    loss = loss.sum(axis=(1, 2))
        if batch_mean:
            loss = loss.mean(axis=0)
        return loss

    @property
    def maximize(self):
        return False


def _sdr_ref(input, target, eps=EPS):
    """Pure-JAX reference for correctness checks."""
    n_dims = input.ndim
    loss = (jnp.sum(target ** 2, axis=n_dims - 1) + eps) / (
        jnp.sum((target - input) ** 2, axis=n_dims - 1) + eps)
    return 10.0 * jnp.log10(loss)


if __name__ == "__main__":
    key = jax.random.PRNGKey(0)
    k1, k2, k3, k4 = jax.random.split(key, 4)

    # 4D case: (batch, n_sources, n_mics, T) — single-pass (grid_k == 1) path.
    B, S, M, T = 2, 3, 2, 256
    x = jax.random.normal(k1, (B, S, M, T), dtype=jnp.float32)
    t = x + 0.1 * jax.random.normal(k2, (B, S, M, T), dtype=jnp.float32)

    criterion = NegSDR(reduction='mean')
    loss = jax.block_until_ready(criterion(x, t, batch_mean=True))
    ref = (-_sdr_ref(x, t)).mean(axis=(1, 2)).mean(axis=0)
    assert jnp.allclose(loss, ref, atol=1e-4, rtol=1e-4), (loss, ref)

    # 3D case with a tiny forced block budget to exercise the multi-step
    # T-reduction kernel (gated ragged-tail mask) at small shapes.
    B2, S2, T2 = 2, 3, 4500
    x2 = jax.random.normal(k3, (B2, S2, T2), dtype=jnp.float32)
    t2 = x2 + 0.05 * jax.random.normal(k4, (B2, S2, T2), dtype=jnp.float32)
    loss2 = jax.block_until_ready(
        -sdr(x2, t2, block_budget_bytes=64 * 1024).sum(axis=1))
    ref2 = (-_sdr_ref(x2, t2)).sum(axis=1)
    assert jnp.allclose(loss2, ref2, atol=1e-4, rtol=1e-4), (loss2, ref2)

    # Same 3D inputs through NegSDR on the default (auto-budget) path.
    loss2b = jax.block_until_ready(NegSDR(reduction='sum')(x2, t2, batch_mean=False))
    assert jnp.allclose(loss2b, ref2, atol=1e-4, rtol=1e-4), (loss2b, ref2)

    # 2D case: (batch, T).
    x3 = x.reshape(B * S * M, T)
    t3 = t.reshape(B * S * M, T)
    loss3 = jax.block_until_ready(NegSDR(reduction=None)(x3, t3, batch_mean=True))
    ref3 = (-_sdr_ref(x3, t3)).mean(axis=0)
    assert jnp.allclose(loss3, ref3, atol=1e-4, rtol=1e-4), (loss3, ref3)

    print("KERNEL_OK")
</pallas_src>

<mosaic_0001>
module attributes {stable_mosaic.version = 11 : i64} {
  func.func @_sdr_kernel_single(%arg0: i32, %arg1: memref<12x256xf32, #tpu.memory_space<vmem>>, %arg2: memref<12x256xf32, #tpu.memory_space<vmem>>, %arg3: memref<12x1xf32, #tpu.memory_space<vmem>>) attributes {dimension_semantics = [#tpu.dimension_semantics<parallel>], iteration_bounds = array<i64: 1>, scalar_prefetch = 0 : i64, scratch_operands = 0 : i64, tpu.core_type = #tpu.core_type<tc>, window_params = [{transform_indices = @transform_0, window_bounds = array<i64: 12, 256>}, {transform_indices = @transform_1, window_bounds = array<i64: 12, 256>}, {transform_indices = @transform_2, window_bounds = array<i64: 12, 1>}]} {
    %c0 = arith.constant 0 : index
    %c0_0 = arith.constant 0 : index
    %0 = vector.load %arg1[%c0, %c0_0] : memref<12x256xf32, #tpu.memory_space<vmem>>, vector<12x256xf32>
    %c0_1 = arith.constant 0 : index
    %c0_2 = arith.constant 0 : index
    %1 = vector.load %arg2[%c0_1, %c0_2] : memref<12x256xf32, #tpu.memory_space<vmem>>, vector<12x256xf32>
    %2 = arith.subf %1, %0 : vector<12x256xf32>
    %3 = arith.mulf %1, %1 : vector<12x256xf32>
    %cst = arith.constant dense<0.000000e+00> : vector<12xf32>
    %4 = vector.multi_reduction <add>, %3, %cst [1] : vector<12x256xf32> to vector<12xf32>
    %5 = vector.shape_cast %4 : vector<12xf32> to vector<12x1xf32>
    %cst_3 = arith.constant 9.99999996E-13 : f32
    %6 = vector.broadcast %cst_3 : f32 to vector<12x1xf32>
    %7 = arith.addf %5, %6 : vector<12x1xf32>
    %8 = arith.mulf %2, %2 : vector<12x256xf32>
    %cst_4 = arith.constant dense<0.000000e+00> : vector<12xf32>
    %9 = vector.multi_reduction <add>, %8, %cst_4 [1] : vector<12x256xf32> to vector<12xf32>
    %10 = vector.shape_cast %9 : vector<12xf32> to vector<12x1xf32>
    %cst_5 = arith.constant 9.99999996E-13 : f32
    %11 = vector.broadcast %cst_5 : f32 to vector<12x1xf32>
    %12 = arith.addf %10, %11 : vector<12x1xf32>
    %13 = math.log %7 : vector<12x1xf32>
    %14 = math.log %12 : vector<12x1xf32>
    %15 = arith.subf %13, %14 : vector<12x1xf32>
    %cst_6 = arith.constant 4.34294462 : f32
    %16 = vector.broadcast %cst_6 : f32 to vector<12x1xf32>
    %17 = arith.mulf %16, %15 : vector<12x1xf32>
    %c0_7 = arith.constant 0 : index
    %c0_8 = arith.constant 0 : index
    %18 = vector.load %arg3[%c0_7, %c0_8] : memref<12x1xf32, #tpu.memory_space<vmem>>, vector<12x1xf32>
    tpu.vector_store %arg3[%c0_7, %c0_8], %17 {strides = array<i32>} : memref<12x1xf32, #tpu.memory_space<vmem>>, vector<12x1xf32>,
    return
  }
  func.func @transform_0(%arg0: i32) -> (i32, i32) {
    %c0_i32 = arith.constant 0 : i32
    %c0_i32_0 = arith.constant 0 : i32
    return %arg0, %c0_i32 : i32, i32
  }
  func.func @transform_1(%arg0: i32) -> (i32, i32) {
    %c0_i32 = arith.constant 0 : i32
    %c0_i32_0 = arith.constant 0 : i32
    return %arg0, %c0_i32 : i32, i32
  }
  func.func @transform_2(%arg0: i32) -> (i32, i32) {
    %c0_i32 = arith.constant 0 : i32
    %c0_i32_0 = arith.constant 0 : i32
    return %arg0, %c0_i32 : i32, i32
  }
}

</mosaic_0001>

<bundles_post_ra>
// kernel: tpu_custom_call.1
= control target key start
LH: loop header
LB: loop body
LE: loop exit
PB: predicated region body
PF: predicated region fallthrough
CT: control target
= control target key end

     0   :  { %7 = vsyncpa [#allocation3], 0  ;;  %s215_s0 = inlined_call_operand.hbm [shape: f32[12,256], index: 0, kind: input, shape index: {}]   ;;  %s216_s1 = inlined_call_operand.hbm [shape: f32[12,256], index: 1, kind: input, shape index: {}]   ;;  %s217_s2 = inlined_call_operand.vmem [shape: f32[12,1], index: 2, kind: output, shape index: {}]  }
   0x1   :  { %8 = vsyncpa [#allocation5], 0  ;;  %s162_s9 = smov [#allocation2]   ;;  %s114_s13 = scalar_lea.hbm %s215_s0, 512 }
   0x2   :  { %s14_s10 = sshll.u32 %s162_s9, 4  ;;  %p115_p0 = scmp.ne.s32.totalorder %s215_s0, %s114_s13  ;;  %s15_s10 = int_to_ptr.vmem [resolvable:$true] %s14_s10 }
   0x3   :  { %p118_p1 = scmp.lt.u32.totalorder %s114_s13, %s215_s0 }
   0x5   :  { %p120_p2 = pnand %p118_p1, %p115_p0 }
   0x7   :  { %123 = shalt.err (!%p120_p2)
}
   0x8   :  { %s124_s18 = scalar_lea.vmem %s15_s10, 512  ;;  %p129_p4 = scmp.lt.s32.totalorder %s15_s10, %s15_s10 }
   0x9   :  { %p125_p3 = scmp.ne.s32.totalorder %s15_s10, %s124_s18  ;;  %p130_p5 = scmp.lt.s32.totalorder %s124_s18, %s124_s18 }
   0xb   :  { %p131_p6 = por %p130_p5, %p129_p4 }
   0xd   :  { %p132_p7 = pnand %p131_p6, %p125_p3 }
   0xf   :  { %135 = shalt.err (!%p132_p7)
}
  0x10   :  { %s163_s19 = smov 256   ;;  %s164_s20 = smov 16  }
  0x11   :  { %20 = dma.hbm_to_vmem [thread:$0]  %s215_s0, 512, %s15_s10, [#allocation3], %s163_s19, %s163_s19, %s164_s20  }
  0x12   :  { %s165_s23 = smov [#allocation4]   ;;  %s136_s27 = scalar_lea.hbm %s216_s1, 512 }
  0x13   :  { %s26_s24 = sshll.u32 %s165_s23, 4  ;;  %p137_p8 = scmp.ne.s32.totalorder %s216_s1, %s136_s27  ;;  %s27_s24 = int_to_ptr.vmem [resolvable:$true] %s26_s24 }
  0x14   :  { %p140_p9 = scmp.lt.u32.totalorder %s136_s27, %s216_s1 }
  0x16   :  { %p142_p10 = pnand %p140_p9, %p137_p8 }
  0x18   :  { %145 = shalt.err (!%p142_p10)
}
  0x19   :  { %s146_s4 = scalar_lea.vmem %s27_s24, 512  ;;  %p151_p12 = scmp.lt.s32.totalorder %s27_s24, %s27_s24 }
  0x1a   :  { %p147_p11 = scmp.ne.s32.totalorder %s27_s24, %s146_s4  ;;  %p152_p13 = scmp.lt.s32.totalorder %s146_s4, %s146_s4 }
  0x1c   :  { %p153_p0 = por %p152_p13, %p151_p12 }
  0x1e   :  { %p154_p1 = pnand %p153_p0, %p147_p11 }
  0x20   :  { %157 = shalt.err (!%p154_p1)
}
  0x21   :  { %32 = dma.hbm_to_vmem [thread:$0]  %s216_s1, 512, %s27_s24, [#allocation5], %s163_s19, %s163_s19, %s164_s20  }
  0x22   :  { %158 = dma.done.wait [#allocation3], 512  }
  0x23   :  { %159 = vsyncadd [#allocation3], 4294966784 }
  0x24   :  { %160 = dma.done.wait [#allocation5], 512  }
  0x25   :  { %161 = vsyncadd [#allocation5], 4294966784  ;;  %v43_v0 = vld [vmem:[#allocation4] sm:$0xff]  ;;  %v44_v1 = vld [vmem:[#allocation4 + $0x8] sm:$0xff]  ;;  %vm58_vm0 = vcmask 1043456   ;;  %vm92_vm1 = vcmask 7168  }
  0x26   :  { %v39_v2 = vld [vmem:[#allocation2] sm:$0xff]  ;;  %v51_v3 = vmul.f32 %v43_v0, %v43_v0  ;;  %v52_v4 = vmul.f32 %v44_v1, %v44_v1  ;;  %v40_v5 = vld [vmem:[#allocation2 + $0x8] sm:$0xff]  ;;  %v45_v7 = vld [vmem:[#allocation4 + $0x10] sm:$0xf]  ;;  %vm94_vm2 = vcmask 3072  }
  0x27   :  { %v47_v6 = vsub.f32 %v43_v0, %v39_v2  ;;  %v46_v8 = vld [vmem:[#allocation4 + $0x18] sm:$0xf]  ;;  %v48_v9 = vsub.f32 %v44_v1, %v40_v5  ;;  %v53_v10 = vmul.f32 %v45_v7, %v45_v7  ;;  %v41_v12 = vld [vmem:[#allocation2 + $0x10] sm:$0xf] }
  0x28   :  { %v54_v11 = vmul.f32 %v46_v8, %v46_v8  ;;  %v42_v13 = vld [vmem:[#allocation2 + $0x18] sm:$0xf]  ;;  %v55_v14 = vadd.f32 %v52_v4, %v51_v3  ;;  %v49_v16 = vsub.f32 %v45_v7, %v41_v12 }
  0x29   :  { %v66_v15 = vmul.f32 %v47_v6, %v47_v6  ;;  %v50_v17 = vsub.f32 %v46_v8, %v42_v13  ;;  %v67_v18 = vmul.f32 %v48_v9, %v48_v9  ;;  %v59_v19 = vsel %vm58_vm0, %v53_v10, 0.0 }
  0x2a   :  { %v60_v20 = vsel %vm58_vm0, %v54_v11, 0.0  ;;  %56 = vadd.xlane.f32.xlu0 %v55_v14  ;;  %v68_v22 = vmul.f32 %v49_v16, %v49_v16 }
  0x2b   :  { %v61_v21 = vadd.f32 %v60_v20, %v59_v19  ;;  %v69_v23 = vmul.f32 %v50_v17, %v50_v17  ;;  %v70_v24 = vadd.f32 %v67_v18, %v66_v15 }
  0x2c   :  { %v73_v25 = vsel %vm58_vm0, %v68_v22, 0.0 }
  0x2d   :  { %v74_v26 = vsel %vm58_vm0, %v69_v23, 0.0  ;;  %71 = vadd.xlane.f32.xlu1 %v70_v24 }
  0x2e   :  { %v75_v27 = vadd.f32 %v74_v26, %v73_v25  ;;  %62 = vadd.xlane.f32.xlu0 %v61_v21 }
  0x31   :  { %76 = vadd.xlane.f32.xlu1 %v75_v27 }
  0xb7   :  { %v57_v28 = vpop.xlane.xlu0 %56 }
  0xb8   :  { %v64_v29 = vadd.f32 1e-12, %v57_v28 }
  0xba   :  { %106 = vlog2.f32 %v64_v29  ;;  %v72_v30 = vpop.xlane.xlu1 %71 }
  0xbb   :  { %v78_v31 = vadd.f32 1e-12, %v72_v30  ;;  %v63_v32 = vpop.xlane.xlu0 %62 }
  0xbc   :  { %v65_v33 = vadd.f32 1e-12, %v63_v32 }
  0xbd   :  { %108 = vlog2.f32 %v78_v31 }
  0xbe   :  { %110 = vlog2.f32 %v65_v33  ;;  %v77_v34 = vpop.xlane.xlu1 %76 }
  0xbf   :  { %v79_v35 = vadd.f32 1e-12, %v77_v34 }
  0xc1   :  { %112 = vlog2.f32 %v79_v35 }
  0xc4   :  { %v107_v36 = vpop.eup %106 }
  0xc5   :  { %v81_v37 = vmul.f32 0.6931472, %v107_v36 }
  0xc7   :  { %v109_v38 = vpop.eup %108 }
  0xc8   :  { %v111_v39 = vpop.eup %110  ;;  %v85_v40 = vmul.f32 0.6931472, %v109_v38 }
  0xc9   :  { %v83_v42 = vmul.f32 0.6931472, %v111_v39 }
  0xca   :  { %v88_v41 = vsub.f32 %v81_v37, %v85_v40 }
  0xcb   :  { %v113_v43 = vpop.eup %112 }
  0xcc   :  { %v90_v44 = vmul.f32 4.3429446, %v88_v41  ;;  %v87_v45 = vmul.f32 0.6931472, %v113_v43 }
  0xce   :  { %93 = vst.msk [vmem:[%s217_s2] sm:$0xff] %vm92_vm1, %v90_v44  ;;  %v89_v46 = vsub.f32 %v83_v42, %v87_v45 }
  0xd0   :  { %v91_v47 = vmul.f32 4.3429446, %v89_v46 }
  0xd2   :  { %95 = vst.msk [vmem:[%s217_s2 + $0x8] sm:$0xf] %vm94_vm2, %v91_v47 }
  0xd3   :  { %100 = vsyncpa [#allocation3], 1 }
  0xd4   :  { %101 = vsyncpa [#allocation5], 1 }

</bundles_post_ra>
